<compile_context>
chip_gen: v6e
topology: v6e:2x2x1
jax: 0.10.0
libtpu: 0.0.40
codegen_flags: <defaults>
</compile_context>

<pallas_src>
import functools
import math

import jax
import jax.numpy as jnp
from jax import lax
from jax.experimental import pallas as pl
from jax.experimental.pallas import tpu as pltpu


def _round_up(x, mult):
    return (x + mult - 1) // mult * mult


def _vmem_capacity_bytes():
    try:
        info = pltpu.get_tpu_info()
        cap = getattr(info, "vmem_capacity_bytes", None)
        if cap:
            return int(cap)
    except Exception:
        pass
    return 64 * 2 ** 20  # conservative fallback (v7x has 64 MiB per TC)


def am_softmax_kernel(x_ref, w_ref, labels_ref, colsum_ref, o_ref,
                      xn_ref, m_run, l_run, s_run, t_run,
                      *, m, s, eps, n_classes, tile_n, has_class_pad):
    ni = pl.program_id(1)
    n_tiles = pl.num_programs(1)

    # ---- init (first class tile of this batch tile):
    #      normalize x once (hoisted out of the class loop), cache it in the MXU
    #      dtype, reset the online-softmax accumulators, and compute
    #      sum_j logits_j = s * xn·colsum(Wn) - s*m analytically (one lane
    #      reduction per batch tile instead of one per class tile).
    @pl.when(ni == 0)
    def _init():
        x = x_ref[...].astype(jnp.float32)
        # F.normalize(x, p=2, dim=1) == x * rsqrt(max(sum(x*x), 1e-24))
        inv = lax.rsqrt(jnp.maximum(jnp.sum(x * x, axis=1, keepdims=True), 1e-24))
        xn = x * inv
        xn_ref[...] = xn.astype(xn_ref.dtype)
        m_run[...] = jnp.full_like(m_run, -jnp.inf)
        l_run[...] = jnp.zeros_like(l_run)
        t_run[...] = jnp.zeros_like(t_run)
        s_run[...] = s * jnp.sum(xn * colsum_ref[...], axis=1, keepdims=True) - (s * m)

    # ---- cosine similarities on the MXU: native (M,K)x(K,N) with pre-normalized,
    #      pre-transposed weights (no per-step normalization or transpose).
    cos = jnp.dot(xn_ref[...], w_ref[...], preferred_element_type=jnp.float32)
    cos = jnp.clip(cos, -1.0, 1.0)

    cls = ni * tile_n + lax.broadcasted_iota(jnp.int32, (1, tile_n), 1)   # (1, tn)
    labels = labels_ref[...]                                              # (tb, 1) int32
    is_tgt = cls == labels                                                # (tb, tn) bool

    logits = s * cos
    logits = jnp.where(is_tgt, logits - (s * m), logits)   # additive margin at target

    def _update(logits_sm):
        m_prev = m_run[...]
        m_new = jnp.maximum(m_prev, jnp.max(logits_sm, axis=1, keepdims=True))
        alpha = jnp.exp(m_prev - m_new)
        p = jnp.exp(logits_sm - m_new)
        l_run[...] = alpha * l_run[...] + jnp.sum(p, axis=1, keepdims=True)
        m_run[...] = m_new
        t_run[...] = t_run[...] + jnp.sum(jnp.where(is_tgt, logits, 0.0),
                                          axis=1, keepdims=True)

    if has_class_pad:
        # Padded classes can only live in the LAST class tile -> mask only there.
        @pl.when(ni == n_tiles - 1)
        def _masked():
            valid = cls < n_classes
            _update(jnp.where(valid, logits, jnp.float32(-1e30)))

        @pl.when(ni < n_tiles - 1)
        def _unmasked():
            _update(logits)
    else:
        _update(logits)

    # ---- finalize: per-row label-smoothed cross entropy
    @pl.when(ni == n_tiles - 1)
    def _fin():
        lse = m_run[...] + jnp.log(l_run[...])
        lp_tgt = t_run[...] - lse                                 # log_prob at target class
        lp_sum = s_run[...] - jnp.float32(n_classes) * lse        # sum_j log_prob[j]
        o_ref[...] = -((1.0 - eps) * lp_tgt + (eps / n_classes) * lp_sum)


def am_softmax_loss(x, weight, labels, *, m=0.35, s=30.0, eps=0.1,
                    tile_b=512, tile_n=2048, mxu_dtype=jnp.bfloat16,
                    min_batch_tiles=1):
    """x: (B, D) float, weight: (N, D) float, labels: (B,) int -> scalar f32 loss.

    min_batch_tiles: set to 2 on v7x so both TensorCores get a 'parallel' block.
    """
    b, d = x.shape
    n, d2 = weight.shape
    assert d == d2, (x.shape, weight.shape)

    x_bytes = x.dtype.itemsize
    w_bytes = jnp.dtype(mxu_dtype).itemsize

    # feature dim padded to the MXU contraction width (zero-pad is numerically free)
    d_pad = _round_up(d, 256)

    # tile selection: large batch tiles (arithmetic intensity per streamed W byte),
    # large class tiles (amortize per-grid-step overhead), shrunk to fit VMEM.
    tb_target = max(8, min(tile_b, -(-b // max(1, min_batch_tiles))))
    tb = min(_round_up(b, 8), _round_up(tb_target, 8))
    tn = min(_round_up(n, 128), _round_up(tile_n, 128))

    vmem_budget = int(0.8 * _vmem_capacity_bytes())

    def _est(tb_, tn_):
        return (2 * tb_ * d_pad * x_bytes          # x tile (double-buffered)
                + 2 * d_pad * tn_ * w_bytes        # streamed W tile (double-buffered)
                + tb_ * d_pad * w_bytes            # cached normalized x
                + 2 * d_pad * 4                    # colsum(Wn)
                + 6 * tb_ * tn_ * 4                # f32 elementwise temporaries
                + 16 * tb_ * 4)                    # accumulators / labels / out

    while tn > 128 and _est(tb, tn) > vmem_budget:
        tn = _round_up(tn // 2, 128)
    while tb > 8 and _est(tb, tn) > vmem_budget:
        tb = _round_up(tb // 2, 8)

    b_pad = _round_up(b, tb)
    n_pad = _round_up(n, tn)
    grid = (b_pad // tb, n_pad // tn)

    # --- one-shot weight prep in plain XLA (outside the hot loop):
    #     row-normalize (torch semantics, no eps), compute the class-sum of the
    #     normalized rows, zero-pad D/N, transpose to native (K, N) = (D, N)
    #     MXU layout, cast to the MXU dtype.
    w32 = weight.astype(jnp.float32)
    w32 = w32 / jnp.linalg.norm(w32, axis=1, keepdims=True)
    colsum = jnp.sum(w32, axis=0)                      # (D,) f32
    if d_pad != d:
        w32 = jnp.pad(w32, ((0, 0), (0, d_pad - d)))
        colsum = jnp.pad(colsum, (0, d_pad - d))
    wnt = w32.T                                        # (d_pad, N)
    if n_pad != n:
        wnt = jnp.pad(wnt, ((0, 0), (0, n_pad - n)))
    wnt = wnt.astype(mxu_dtype)
    colsum = colsum.reshape(1, d_pad)

    xp = x
    if d_pad != d:
        xp = jnp.pad(xp, ((0, 0), (0, d_pad - d)))
    if b_pad != b:
        xp = jnp.pad(xp, ((0, b_pad - b), (0, 0)))

    lbl = labels.astype(jnp.int32).reshape(b, 1)
    if b_pad != b:
        lbl = jnp.pad(lbl, ((0, b_pad - b), (0, 0)))

    kern = functools.partial(
        am_softmax_kernel, m=float(m), s=float(s), eps=float(eps),
        n_classes=n, tile_n=tn, has_class_pad=(n_pad != n))

    vmem_limit = int(min(vmem_budget, max(32 * 2 ** 20, int(1.5 * _est(tb, tn)))))

    cost = pl.CostEstimate(
        flops=2 * b_pad * n_pad * d_pad,
        transcendentals=b_pad * n_pad + 4 * b_pad,
        bytes_accessed=(b_pad * d_pad * x_bytes
                        + grid[0] * n_pad * d_pad * w_bytes
                        + 3 * b_pad * 4),
    )

    # TODO(synk): labels stay as a tiny (tb, 1) VMEM block instead of SMEM
    # scalar-prefetch; building a per-row label vector from SMEM scalars is not
    # worth the lowering risk here.
    per_row = pl.pallas_call(
        kern,
        out_shape=jax.ShapeDtypeStruct((b_pad, 1), jnp.float32),
        grid_spec=pltpu.PrefetchScalarGridSpec(
            num_scalar_prefetch=0,
            grid=grid,
            in_specs=[
                pl.BlockSpec((tb, d_pad), lambda bi, ni: (bi, 0)),   # x tile (resident across N)
                pl.BlockSpec((d_pad, tn), lambda bi, ni: (0, ni)),   # streamed (K, N) weight tile
                pl.BlockSpec((tb, 1), lambda bi, ni: (bi, 0)),       # labels for this batch tile
                pl.BlockSpec((1, d_pad), lambda bi, ni: (0, 0)),     # colsum of normalized W
            ],
            out_specs=pl.BlockSpec((tb, 1), lambda bi, ni: (bi, 0)),
            scratch_shapes=[
                pltpu.VMEM((tb, d_pad), mxu_dtype),   # cached normalized x (MXU dtype)
                pltpu.VMEM((tb, 1), jnp.float32),     # running max
                pltpu.VMEM((tb, 1), jnp.float32),     # running sum exp
                pltpu.VMEM((tb, 1), jnp.float32),     # sum of logits (analytic, set at init)
                pltpu.VMEM((tb, 1), jnp.float32),     # target logit
            ],
        ),
        compiler_params=pltpu.CompilerParams(
            dimension_semantics=("parallel", "arbitrary"),
            vmem_limit_bytes=vmem_limit,
        ),
        cost_estimate=cost,
    )(xp, wnt, lbl, colsum)

    # drop padded rows, mean over the real batch (sum over classes already folded in)
    return jnp.sum(per_row[:b, 0]) / b


def reference_loss(x, weight, labels, *, m=0.35, s=30.0, eps=0.1):
    """Plain-JAX reference mirroring the PyTorch module, for sanity checking."""
    x = x / jnp.maximum(jnp.linalg.norm(x, axis=1, keepdims=True), 1e-12)
    w = weight / jnp.linalg.norm(weight, axis=1, keepdims=True)
    cos = jnp.clip(x @ w.T, -1.0, 1.0)
    n = weight.shape[0]
    b = x.shape[0]
    onehot = jax.nn.one_hot(labels, n, dtype=jnp.float32)
    logits = s * (cos - m * onehot)
    log_probs = jax.nn.log_softmax(logits, axis=1)
    targets = (1.0 - eps) * onehot + eps / n
    return jnp.sum(-targets * log_probs) / b


if __name__ == "__main__":
    # Small shapes consistent with the module: feature dim d, num_classes n, batch b.
    B, D, N = 8, 256, 16
    M, S, EPS = 0.35, 30.0, 0.1

    key = jax.random.PRNGKey(0)
    kx, kw, kl = jax.random.split(key, 3)

    x = jax.random.normal(kx, (B, D), dtype=jnp.float32)
    bound = 1.0 / math.sqrt(D)
    weight = jax.random.uniform(kw, (N, D), minval=-bound, maxval=bound, dtype=jnp.float32)
    labels = jax.random.randint(kl, (B,), 0, N, dtype=jnp.int32)

    ref = reference_loss(x, weight, labels, m=M, s=S, eps=EPS)

    # Exactness check: f32-MXU variant against the f32 reference.
    loss_f32 = am_softmax_loss(x, weight, labels, m=M, s=S, eps=EPS,
                               mxu_dtype=jnp.float32)
    loss_f32 = jax.block_until_ready(loss_f32)
    assert jnp.allclose(loss_f32, ref, atol=1e-3, rtol=1e-3), (loss_f32, ref)

    # Performance path (default): bf16 MXU operands; tolerance covers bf16
    # rounding of cos after the s=30 logit scaling.
    loss_bf16 = am_softmax_loss(x, weight, labels, m=M, s=S, eps=EPS)
    loss_bf16 = jax.block_until_ready(loss_bf16)
    assert jnp.allclose(loss_bf16, ref, atol=5e-2, rtol=5e-2), (loss_bf16, ref)

    print("KERNEL_OK")
</pallas_src>

<mosaic_0001>
module attributes {stable_mosaic.version = 11 : i64} {
  func.func @am_softmax_kernel(%arg0: i32, %arg1: i32, %arg2: memref<8x256xf32, #tpu.memory_space<vmem>>, %arg3: memref<256x128xf32, #tpu.memory_space<vmem>>, %arg4: memref<8x1xi32, #tpu.memory_space<vmem>>, %arg5: memref<1x256xf32, #tpu.memory_space<vmem>>, %arg6: memref<8x1xf32, #tpu.memory_space<vmem>>, %arg7: memref<8x256xf32, #tpu.memory_space<vmem>>, %arg8: memref<8x1xf32, #tpu.memory_space<vmem>>, %arg9: memref<8x1xf32, #tpu.memory_space<vmem>>, %arg10: memref<8x1xf32, #tpu.memory_space<vmem>>, %arg11: memref<8x1xf32, #tpu.memory_space<vmem>>) attributes {dimension_semantics = [#tpu.dimension_semantics<parallel>, #tpu.dimension_semantics<arbitrary>], iteration_bounds = array<i64: 1, 1>, scalar_prefetch = 0 : i64, scratch_operands = 5 : i64, tpu.core_type = #tpu.core_type<tc>, window_params = [{transform_indices = @transform_0, window_bounds = array<i64: 8, 256>}, {transform_indices = @transform_1, window_bounds = array<i64: 256, 128>}, {transform_indices = @transform_2, window_bounds = array<i64: 8, 1>}, {pipeline_mode = #tpu.pipeline_mode<synchronous>, transform_indices = @transform_3, window_bounds = array<i64: 1, 256>}, {transform_indices = @transform_4, window_bounds = array<i64: 8, 1>}]} {
    %c0_i32 = arith.constant 0 : i32
    %0 = arith.cmpi eq, %arg1, %c0_i32 : i32
    %1 = arith.extui %0 : i1 to i32
    %c0_i32_0 = arith.constant 0 : i32
    %2 = arith.cmpi ne, %1, %c0_i32_0 : i32
    scf.if %2 {
      %c0_16 = arith.constant 0 : index
      %c0_17 = arith.constant 0 : index
      %32 = vector.load %arg2[%c0_16, %c0_17] : memref<8x256xf32, #tpu.memory_space<vmem>>, vector<8x256xf32>
      %33 = arith.mulf %32, %32 : vector<8x256xf32>
      %cst_18 = arith.constant dense<0.000000e+00> : vector<8xf32>
      %34 = vector.multi_reduction <add>, %33, %cst_18 [1] : vector<8x256xf32> to vector<8xf32>
      %35 = vector.shape_cast %34 : vector<8xf32> to vector<8x1xf32>
      %cst_19 = arith.constant 1.000000e-24 : f32
      %36 = vector.broadcast %cst_19 : f32 to vector<8x1xf32>
      %37 = arith.maximumf %35, %36 : vector<8x1xf32>
      %38 = math.rsqrt %37 : vector<8x1xf32>
      %39 = vector.broadcast %38 : vector<8x1xf32> to vector<8x256xf32>
      %40 = arith.mulf %32, %39 : vector<8x256xf32>
      %c0_20 = arith.constant 0 : index
      %c0_21 = arith.constant 0 : index
      %41 = vector.load %arg7[%c0_20, %c0_21] : memref<8x256xf32, #tpu.memory_space<vmem>>, vector<8x256xf32>
      tpu.vector_store %arg7[%c0_20, %c0_21], %40 {strides = array<i32>} : memref<8x256xf32, #tpu.memory_space<vmem>>, vector<8x256xf32>,
      %cst_22 = arith.constant 0xFF800000 : f32
      %42 = vector.broadcast %cst_22 : f32 to vector<8x1xf32>
      %c0_23 = arith.constant 0 : index
      %c0_24 = arith.constant 0 : index
      %43 = vector.load %arg8[%c0_23, %c0_24] : memref<8x1xf32, #tpu.memory_space<vmem>>, vector<8x1xf32>
      tpu.vector_store %arg8[%c0_23, %c0_24], %42 {strides = array<i32>} : memref<8x1xf32, #tpu.memory_space<vmem>>, vector<8x1xf32>,
      %cst_25 = arith.constant 0.000000e+00 : f32
      %44 = vector.broadcast %cst_25 : f32 to vector<8x1xf32>
      %c0_26 = arith.constant 0 : index
      %c0_27 = arith.constant 0 : index
      %45 = vector.load %arg9[%c0_26, %c0_27] : memref<8x1xf32, #tpu.memory_space<vmem>>, vector<8x1xf32>
      tpu.vector_store %arg9[%c0_26, %c0_27], %44 {strides = array<i32>} : memref<8x1xf32, #tpu.memory_space<vmem>>, vector<8x1xf32>,
      %cst_28 = arith.constant 0.000000e+00 : f32
      %46 = vector.broadcast %cst_28 : f32 to vector<8x1xf32>
      %c0_29 = arith.constant 0 : index
      %c0_30 = arith.constant 0 : index
      %47 = vector.load %arg11[%c0_29, %c0_30] : memref<8x1xf32, #tpu.memory_space<vmem>>, vector<8x1xf32>
      tpu.vector_store %arg11[%c0_29, %c0_30], %46 {strides = array<i32>} : memref<8x1xf32, #tpu.memory_space<vmem>>, vector<8x1xf32>,
      %c0_31 = arith.constant 0 : index
      %c0_32 = arith.constant 0 : index
      %48 = vector.load %arg5[%c0_31, %c0_32] : memref<1x256xf32, #tpu.memory_space<vmem>>, vector<1x256xf32>
      %49 = vector.broadcast %48 : vector<1x256xf32> to vector<8x256xf32>
      %50 = arith.mulf %40, %49 : vector<8x256xf32>
      %cst_33 = arith.constant dense<0.000000e+00> : vector<8xf32>
      %51 = vector.multi_reduction <add>, %50, %cst_33 [1] : vector<8x256xf32> to vector<8xf32>
      %52 = vector.shape_cast %51 : vector<8xf32> to vector<8x1xf32>
      %cst_34 = arith.constant 3.000000e+01 : f32
      %53 = vector.broadcast %cst_34 : f32 to vector<8x1xf32>
      %54 = arith.mulf %53, %52 : vector<8x1xf32>
      %cst_35 = arith.constant 1.050000e+01 : f32
      %55 = vector.broadcast %cst_35 : f32 to vector<8x1xf32>
      %56 = arith.subf %54, %55 : vector<8x1xf32>
      %c0_36 = arith.constant 0 : index
      %c0_37 = arith.constant 0 : index
      %57 = vector.load %arg10[%c0_36, %c0_37] : memref<8x1xf32, #tpu.memory_space<vmem>>, vector<8x1xf32>
      tpu.vector_store %arg10[%c0_36, %c0_37], %56 {strides = array<i32>} : memref<8x1xf32, #tpu.memory_space<vmem>>, vector<8x1xf32>,
    } else {
    }
    %c0 = arith.constant 0 : index
    %c0_1 = arith.constant 0 : index
    %3 = vector.load %arg7[%c0, %c0_1] : memref<8x256xf32, #tpu.memory_space<vmem>>, vector<8x256xf32>
    %c0_2 = arith.constant 0 : index
    %c0_3 = arith.constant 0 : index
    %4 = vector.load %arg3[%c0_2, %c0_3] : memref<256x128xf32, #tpu.memory_space<vmem>>, vector<256x128xf32>
    %cst = arith.constant dense<0.000000e+00> : vector<8x128xf32>
    %5 = tpu.matmul %3, %4, %cst {dimension_numbers = #tpu.dot_dimension_numbers<[1], [0], [0], [1], [0, 0, 1, 1], [], []>} : vector<8x256xf32>, vector<256x128xf32>, vector<8x128xf32> -> vector<8x128xf32>
    %cst_4 = arith.constant -1.000000e+00 : f32
    %cst_5 = arith.constant 1.000000e+00 : f32
    %6 = vector.broadcast %cst_4 : f32 to vector<8x128xf32>
    %7 = arith.maximumf %6, %5 : vector<8x128xf32>
    %8 = vector.broadcast %cst_5 : f32 to vector<8x128xf32>
    %9 = arith.minimumf %8, %7 : vector<8x128xf32>
    %c128_i32 = arith.constant 128 : i32
    %10 = arith.muli %arg1, %c128_i32 : i32
    %11 = tpu.iota {dimensions = array<i32: 1>} : vector<1x128xi32>
    %12 = vector.broadcast %10 : i32 to vector<1x128xi32>
    %13 = arith.addi %12, %11 : vector<1x128xi32>
    %c0_6 = arith.constant 0 : index
    %c0_7 = arith.constant 0 : index
    %14 = vector.load %arg4[%c0_6, %c0_7] : memref<8x1xi32, #tpu.memory_space<vmem>>, vector<8x1xi32>
    %15 = vector.broadcast %13 : vector<1x128xi32> to vector<8x128xi32>
    %16 = vector.broadcast %14 : vector<8x1xi32> to vector<8x128xi32>
    %17 = arith.cmpi eq, %15, %16 : vector<8x128xi32>
    %cst_8 = arith.constant 3.000000e+01 : f32
    %18 = vector.broadcast %cst_8 : f32 to vector<8x128xf32>
    %19 = arith.mulf %18, %9 : vector<8x128xf32>
    %cst_9 = arith.constant 1.050000e+01 : f32
    %20 = vector.broadcast %cst_9 : f32 to vector<8x128xf32>
    %21 = arith.subf %19, %20 : vector<8x128xf32>
    %22 = arith.select %17, %21, %19 : vector<8x128xi1>, vector<8x128xf32>
    %c0_i32_10 = arith.constant 0 : i32
    %23 = arith.cmpi eq, %arg1, %c0_i32_10 : i32
    %24 = arith.extui %23 : i1 to i32
    %c0_i32_11 = arith.constant 0 : i32
    %25 = arith.cmpi ne, %24, %c0_i32_11 : i32
    scf.if %25 {
      %c16_i32 = arith.constant 16 : i32
      %32 = vector.broadcast %c16_i32 : i32 to vector<1x128xi32>
      %33 = arith.cmpi slt, %13, %32 : vector<1x128xi32>
      %cst_16 = arith.constant -1.000000e+30 : f32
      %34 = vector.shape_cast %33 : vector<1x128xi1> to vector<1x128xi1>
      %35 = vector.broadcast %34 : vector<1x128xi1> to vector<8x128xi1>
      %36 = vector.broadcast %cst_16 : f32 to vector<8x128xf32>
      %37 = arith.select %35, %22, %36 : vector<8x128xi1>, vector<8x128xf32>
      %c0_17 = arith.constant 0 : index
      %c0_18 = arith.constant 0 : index
      %38 = vector.load %arg8[%c0_17, %c0_18] : memref<8x1xf32, #tpu.memory_space<vmem>>, vector<8x1xf32>
      %cst_19 = arith.constant dense<0xFF800000> : vector<8xf32>
      %39 = vector.multi_reduction <maximumf>, %37, %cst_19 [1] : vector<8x128xf32> to vector<8xf32>
      %40 = vector.shape_cast %39 : vector<8xf32> to vector<8x1xf32>
      %41 = arith.maximumf %38, %40 : vector<8x1xf32>
      %42 = arith.subf %38, %41 : vector<8x1xf32>
      %43 = math.exp %42 : vector<8x1xf32>
      %44 = vector.broadcast %41 : vector<8x1xf32> to vector<8x128xf32>
      %45 = arith.subf %37, %44 : vector<8x128xf32>
      %46 = math.exp %45 : vector<8x128xf32>
      %c0_20 = arith.constant 0 : index
      %c0_21 = arith.constant 0 : index
      %47 = vector.load %arg9[%c0_20, %c0_21] : memref<8x1xf32, #tpu.memory_space<vmem>>, vector<8x1xf32>
      %48 = arith.mulf %43, %47 : vector<8x1xf32>
      %cst_22 = arith.constant dense<0.000000e+00> : vector<8xf32>
      %49 = vector.multi_reduction <add>, %46, %cst_22 [1] : vector<8x128xf32> to vector<8xf32>
      %50 = vector.shape_cast %49 : vector<8xf32> to vector<8x1xf32>
      %51 = arith.addf %48, %50 : vector<8x1xf32>
      %c0_23 = arith.constant 0 : index
      %c0_24 = arith.constant 0 : index
      %52 = vector.load %arg9[%c0_23, %c0_24] : memref<8x1xf32, #tpu.memory_space<vmem>>, vector<8x1xf32>
      tpu.vector_store %arg9[%c0_23, %c0_24], %51 {strides = array<i32>} : memref<8x1xf32, #tpu.memory_space<vmem>>, vector<8x1xf32>,
      %c0_25 = arith.constant 0 : index
      %c0_26 = arith.constant 0 : index
      %53 = vector.load %arg8[%c0_25, %c0_26] : memref<8x1xf32, #tpu.memory_space<vmem>>, vector<8x1xf32>
      tpu.vector_store %arg8[%c0_25, %c0_26], %41 {strides = array<i32>} : memref<8x1xf32, #tpu.memory_space<vmem>>, vector<8x1xf32>,
      %c0_27 = arith.constant 0 : index
      %c0_28 = arith.constant 0 : index
      %54 = vector.load %arg11[%c0_27, %c0_28] : memref<8x1xf32, #tpu.memory_space<vmem>>, vector<8x1xf32>
      %cst_29 = arith.constant 0.000000e+00 : f32
      %55 = vector.broadcast %cst_29 : f32 to vector<8x128xf32>
      %56 = arith.select %17, %22, %55 : vector<8x128xi1>, vector<8x128xf32>
      %cst_30 = arith.constant dense<0.000000e+00> : vector<8xf32>
      %57 = vector.multi_reduction <add>, %56, %cst_30 [1] : vector<8x128xf32> to vector<8xf32>
      %58 = vector.shape_cast %57 : vector<8xf32> to vector<8x1xf32>
      %59 = arith.addf %54, %58 : vector<8x1xf32>
      %c0_31 = arith.constant 0 : index
      %c0_32 = arith.constant 0 : index
      %60 = vector.load %arg11[%c0_31, %c0_32] : memref<8x1xf32, #tpu.memory_space<vmem>>, vector<8x1xf32>
      tpu.vector_store %arg11[%c0_31, %c0_32], %59 {strides = array<i32>} : memref<8x1xf32, #tpu.memory_space<vmem>>, vector<8x1xf32>,
    } else {
    }
    %c0_i32_12 = arith.constant 0 : i32
    %26 = arith.cmpi slt, %arg1, %c0_i32_12 : i32
    %27 = arith.extui %26 : i1 to i32
    %c0_i32_13 = arith.constant 0 : i32
    %28 = arith.cmpi ne, %27, %c0_i32_13 : i32
    scf.if %28 {
      %c0_16 = arith.constant 0 : index
      %c0_17 = arith.constant 0 : index
      %32 = vector.load %arg8[%c0_16, %c0_17] : memref<8x1xf32, #tpu.memory_space<vmem>>, vector<8x1xf32>
      %cst_18 = arith.constant dense<0xFF800000> : vector<8xf32>
      %33 = vector.multi_reduction <maximumf>, %22, %cst_18 [1] : vector<8x128xf32> to vector<8xf32>
      %34 = vector.shape_cast %33 : vector<8xf32> to vector<8x1xf32>
      %35 = arith.maximumf %32, %34 : vector<8x1xf32>
      %36 = arith.subf %32, %35 : vector<8x1xf32>
      %37 = math.exp %36 : vector<8x1xf32>
      %38 = vector.broadcast %35 : vector<8x1xf32> to vector<8x128xf32>
      %39 = arith.subf %22, %38 : vector<8x128xf32>
      %40 = math.exp %39 : vector<8x128xf32>
      %c0_19 = arith.constant 0 : index
      %c0_20 = arith.constant 0 : index
      %41 = vector.load %arg9[%c0_19, %c0_20] : memref<8x1xf32, #tpu.memory_space<vmem>>, vector<8x1xf32>
      %42 = arith.mulf %37, %41 : vector<8x1xf32>
      %cst_21 = arith.constant dense<0.000000e+00> : vector<8xf32>
      %43 = vector.multi_reduction <add>, %40, %cst_21 [1] : vector<8x128xf32> to vector<8xf32>
      %44 = vector.shape_cast %43 : vector<8xf32> to vector<8x1xf32>
      %45 = arith.addf %42, %44 : vector<8x1xf32>
      %c0_22 = arith.constant 0 : index
      %c0_23 = arith.constant 0 : index
      %46 = vector.load %arg9[%c0_22, %c0_23] : memref<8x1xf32, #tpu.memory_space<vmem>>, vector<8x1xf32>
      tpu.vector_store %arg9[%c0_22, %c0_23], %45 {strides = array<i32>} : memref<8x1xf32, #tpu.memory_space<vmem>>, vector<8x1xf32>,
      %c0_24 = arith.constant 0 : index
      %c0_25 = arith.constant 0 : index
      %47 = vector.load %arg8[%c0_24, %c0_25] : memref<8x1xf32, #tpu.memory_space<vmem>>, vector<8x1xf32>
      tpu.vector_store %arg8[%c0_24, %c0_25], %35 {strides = array<i32>} : memref<8x1xf32, #tpu.memory_space<vmem>>, vector<8x1xf32>,
      %c0_26 = arith.constant 0 : index
      %c0_27 = arith.constant 0 : index
      %48 = vector.load %arg11[%c0_26, %c0_27] : memref<8x1xf32, #tpu.memory_space<vmem>>, vector<8x1xf32>
      %cst_28 = arith.constant 0.000000e+00 : f32
      %49 = vector.broadcast %cst_28 : f32 to vector<8x128xf32>
      %50 = arith.select %17, %22, %49 : vector<8x128xi1>, vector<8x128xf32>
      %cst_29 = arith.constant dense<0.000000e+00> : vector<8xf32>
      %51 = vector.multi_reduction <add>, %50, %cst_29 [1] : vector<8x128xf32> to vector<8xf32>
      %52 = vector.shape_cast %51 : vector<8xf32> to vector<8x1xf32>
      %53 = arith.addf %48, %52 : vector<8x1xf32>
      %c0_30 = arith.constant 0 : index
      %c0_31 = arith.constant 0 : index
      %54 = vector.load %arg11[%c0_30, %c0_31] : memref<8x1xf32, #tpu.memory_space<vmem>>, vector<8x1xf32>
      tpu.vector_store %arg11[%c0_30, %c0_31], %53 {strides = array<i32>} : memref<8x1xf32, #tpu.memory_space<vmem>>, vector<8x1xf32>,
    } else {
    }
    %c0_i32_14 = arith.constant 0 : i32
    %29 = arith.cmpi eq, %arg1, %c0_i32_14 : i32
    %30 = arith.extui %29 : i1 to i32
    %c0_i32_15 = arith.constant 0 : i32
    %31 = arith.cmpi ne, %30, %c0_i32_15 : i32
    scf.if %31 {
      %c0_16 = arith.constant 0 : index
      %c0_17 = arith.constant 0 : index
      %32 = vector.load %arg8[%c0_16, %c0_17] : memref<8x1xf32, #tpu.memory_space<vmem>>, vector<8x1xf32>
      %c0_18 = arith.constant 0 : index
      %c0_19 = arith.constant 0 : index
      %33 = vector.load %arg9[%c0_18, %c0_19] : memref<8x1xf32, #tpu.memory_space<vmem>>, vector<8x1xf32>
      %34 = math.log %33 : vector<8x1xf32>
      %35 = arith.addf %32, %34 : vector<8x1xf32>
      %c0_20 = arith.constant 0 : index
      %c0_21 = arith.constant 0 : index
      %36 = vector.load %arg11[%c0_20, %c0_21] : memref<8x1xf32, #tpu.memory_space<vmem>>, vector<8x1xf32>
      %37 = arith.subf %36, %35 : vector<8x1xf32>
      %c0_22 = arith.constant 0 : index
      %c0_23 = arith.constant 0 : index
      %38 = vector.load %arg10[%c0_22, %c0_23] : memref<8x1xf32, #tpu.memory_space<vmem>>, vector<8x1xf32>
      %cst_24 = arith.constant 1.600000e+01 : f32
      %39 = vector.broadcast %cst_24 : f32 to vector<8x1xf32>
      %40 = arith.mulf %39, %35 : vector<8x1xf32>
      %41 = arith.subf %38, %40 : vector<8x1xf32>
      %cst_25 = arith.constant 0.899999976 : f32
      %42 = vector.broadcast %cst_25 : f32 to vector<8x1xf32>
      %43 = arith.mulf %42, %37 : vector<8x1xf32>
      %cst_26 = arith.constant 6.250000e-03 : f32
      %44 = vector.broadcast %cst_26 : f32 to vector<8x1xf32>
      %45 = arith.mulf %44, %41 : vector<8x1xf32>
      %46 = arith.addf %43, %45 : vector<8x1xf32>
      %cst_27 = arith.constant 0.000000e+00 : f32
      %47 = vector.broadcast %cst_27 : f32 to vector<8x1xf32>
      %48 = arith.subf %47, %46 : vector<8x1xf32>
      %c0_28 = arith.constant 0 : index
      %c0_29 = arith.constant 0 : index
      %49 = vector.load %arg6[%c0_28, %c0_29] : memref<8x1xf32, #tpu.memory_space<vmem>>, vector<8x1xf32>
      tpu.vector_store %arg6[%c0_28, %c0_29], %48 {strides = array<i32>} : memref<8x1xf32, #tpu.memory_space<vmem>>, vector<8x1xf32>,
    } else {
    }
    return
  }
  func.func @transform_0(%arg0: i32, %arg1: i32) -> (i32, i32) {
    %c0_i32 = arith.constant 0 : i32
    %c0_i32_0 = arith.constant 0 : i32
    return %arg0, %c0_i32 : i32, i32
  }
  func.func @transform_1(%arg0: i32, %arg1: i32) -> (i32, i32) {
    %c0_i32 = arith.constant 0 : i32
    %c0_i32_0 = arith.constant 0 : i32
    return %c0_i32, %arg1 : i32, i32
  }
  func.func @transform_2(%arg0: i32, %arg1: i32) -> (i32, i32) {
    %c0_i32 = arith.constant 0 : i32
    %c0_i32_0 = arith.constant 0 : i32
    return %arg0, %c0_i32 : i32, i32
  }
  func.func @transform_3(%arg0: i32, %arg1: i32) -> (i32, i32) {
    %c0_i32 = arith.constant 0 : i32
    %c0_i32_0 = arith.constant 0 : i32
    %c0_i32_1 = arith.constant 0 : i32
    return %c0_i32, %c0_i32_0 : i32, i32
  }
  func.func @transform_4(%arg0: i32, %arg1: i32) -> (i32, i32) {
    %c0_i32 = arith.constant 0 : i32
    %c0_i32_0 = arith.constant 0 : i32
    return %arg0, %c0_i32 : i32, i32
  }
}

</mosaic_0001>

<bundles_post_ra>
// kernel: tpu_custom_call.1
= control target key start
LH: loop header
LB: loop body
LE: loop exit
PB: predicated region body
PF: predicated region fallthrough
CT: control target
= control target key end

     0   :  { %9 = vsyncpa [#allocation8], 0  ;;  %s463_s0 = inlined_call_operand.hbm [shape: f32[8,256], index: 0, kind: input, shape index: {}]   ;;  %s464_s1 = inlined_call_operand.hbm [shape: f32[256,128], index: 1, kind: input, shape index: {}]   ;;  %s465_s2 = inlined_call_operand.vmem [shape: s32[8,1], index: 2, kind: input, shape index: {}]   ;;  %s466_s3 = inlined_call_operand.vmem [shape: f32[1,256], index: 3, kind: input, shape index: {}]   ;;  %s467_s4 = inlined_call_operand.vmem [shape: f32[8,1], index: 4, kind: output, shape index: {}]  }
   0x1   :  { %10 = vsyncpa [#allocation10], 0  ;;  %s396_s15 = smov [#allocation7]   ;;  %s397_s17 = smov [#allocation9]  }
   0x2   :  { %s17_s16 = sshll.u32 %s396_s15, 4  ;;  %s26_s18 = sshll.u32 %s397_s17, 4  ;;  %s18_s16 = int_to_ptr.vmem [resolvable:$true] %s17_s16  ;;  %s27_s18 = int_to_ptr.vmem [resolvable:$true] %s26_s18 }
   0x3   :  { %s360_s19 = scalar_lea.vmem %s18_s16, 256  ;;  %p365_p1 = scmp.lt.s32.totalorder %s18_s16, %s18_s16 }
   0x4   :  { %p361_p0 = scmp.ne.s32.totalorder %s18_s16, %s360_s19  ;;  %p366_p2 = scmp.lt.s32.totalorder %s360_s19, %s360_s19 }
   0x6   :  { %p367_p3 = por %p366_p2, %p365_p1 }
   0x8   :  { %p368_p4 = pnand %p367_p3, %p361_p0 }
   0xa   :  { %371 = shalt.err (!%p368_p4)
}
   0xb   :  { %20 = dma.hbm_to_vmem [thread:$0]  %s463_s0, 256, %s18_s16, [#allocation8]  }
   0xc   :  { %s380_s22 = scalar_lea.vmem %s27_s18, 4096  ;;  %p385_p6 = scmp.lt.s32.totalorder %s27_s18, %s27_s18 }
   0xd   :  { %p381_p5 = scmp.ne.s32.totalorder %s27_s18, %s380_s22  ;;  %p386_p7 = scmp.lt.s32.totalorder %s380_s22, %s380_s22 }
   0xf   :  { %p387_p8 = por %p386_p7, %p385_p6 }
  0x11   :  { %p388_p9 = pnand %p387_p8, %p381_p5 }
  0x13   :  { %391 = shalt.err (!%p388_p9)
}
  0x14   :  { %s398_s23 = smov 128   ;;  %s399_s24 = smov 8  }
  0x15   :  { %32 = dma.hbm_to_vmem [thread:$0]  %s464_s1, 4096, %s27_s18, [#allocation10], %s398_s23, %s398_s23, %s399_s24  }
  0x16   :  { %392 = dma.done.wait [#allocation8], 256  }
  0x17   :  { %393 = vsyncadd [#allocation8], 4294967040 }
  0x18   :  { %394 = dma.done.wait [#allocation10], 4096  }
  0x19   :  { %395 = vsyncadd [#allocation10], 4294963200  ;;  %v400_v0 = vmov 0   ;;  %v434_v1 = vld [vmem:[#allocation7] sm:$0xff]  ;;  %v436_v2 = vld [vmem:[#allocation7 + $0x8] sm:$0xff]  ;;  %v66_v41 = vlaneseq  ;;  %vm60_vm1 = vcmask 7168  }
  0x1a   :  { %342 = vset.pattern.permute.xlu0 %v400_v0  ;;  %343 = vset.pattern.permute.xlu1 %v400_v0  ;;  %v117_v3 = vld [vmem:[#allocation9 + $0xf8] sm:$0xff]  ;;  %v49_v4 = vmul.f32 %v434_v1, %v434_v1  ;;  %v50_v5 = vmul.f32 %v436_v2, %v436_v2  ;;  %v116_v7 = vld [vmem:[#allocation9 + $0xf0] sm:$0xff]  ;;  %v115_v9 = vld [vmem:[#allocation9 + $0xe8] sm:$0xff]  ;;  %v401_v56 = vmov -inf  }
  0x1b   :  { %300 = vmatprep.subr.mxu0 %v117_v3  ;;  %v101_v6 = vld [vmem:[#allocation9 + $0x78] sm:$0xff]  ;;  %v100_v8 = vld [vmem:[#allocation9 + $0x70] sm:$0xff]  ;;  %v99_v11 = vld [vmem:[#allocation9 + $0x68] sm:$0xff]  ;;  %v192_v42 = vand.u32 127, %v66_v41  ;;  %v67_v43 = vshrl.u32 %v66_v41, 7  ;;  %61 = vst.msk [vmem:[#allocation3] sm:$0xff] %vm60_vm1, %v401_v56 }
  0x1c   :  { %301 = vmatpush3.msra.mxu0 %v101_v6  ;;  %v51_v10 = vadd.f32 %v50_v5, %v49_v4  ;;  %v114_v12 = vld [vmem:[#allocation9 + $0xe0] sm:$0xff]  ;;  %v113_v14 = vld [vmem:[#allocation9 + $0xd8] sm:$0xff]  ;;  %v112_v16 = vld [vmem:[#allocation9 + $0xd0] sm:$0xff]  ;;  %v402_v5 = vmov 0.0  }
  0x1d   :  { %302 = vmatprep.subr.mxu0 %v116_v7  ;;  %v98_v13 = vld [vmem:[#allocation9 + $0x60] sm:$0xff]  ;;  %v97_v15 = vld [vmem:[#allocation9 + $0x58] sm:$0xff]  ;;  %v96_v17 = vld [vmem:[#allocation9 + $0x50] sm:$0xff]  ;;  %v68_v45 = vsub.s32 0, %v67_v43  ;;  %v72_v46 = vsub.s32 1, %v67_v43  ;;  %vm206_vm2 = vcmp.lt.s32.totalorder %v192_v42, 16 }
  0x1e   :  { %303 = vmatpush3.msra.mxu0 %v100_v8  ;;  %52 = vadd.xlane.f32.xlu0 %v51_v10  ;;  %v111_v18 = vld [vmem:[#allocation9 + $0xc8] sm:$0xff]  ;;  %v110_v20 = vld [vmem:[#allocation9 + $0xc0] sm:$0xff]  ;;  %v109_v22 = vld [vmem:[#allocation9 + $0xb8] sm:$0xff]  ;;  %62 = vst.msk [vmem:[#allocation4] sm:$0xff] %vm60_vm1, %v402_v5 }
  0x1f   :  { %304 = vmatprep.subr.mxu0 %v115_v9  ;;  %v95_v19 = vld [vmem:[#allocation9 + $0x48] sm:$0xff]  ;;  %v94_v21 = vld [vmem:[#allocation9 + $0x40] sm:$0xff]  ;;  %v93_v23 = vld [vmem:[#allocation9 + $0x38] sm:$0xff]  ;;  %63 = vst.msk [vmem:[#allocation6] sm:$0xff] %vm60_vm1, %v402_v5 }
  0x20   :  { %305 = vmatpush3.msra.mxu0 %v99_v11  ;;  %v108_v24 = vld [vmem:[#allocation9 + $0xb0] sm:$0xff]  ;;  %v107_v26 = vld [vmem:[#allocation9 + $0xa8] sm:$0xff]  ;;  %v106_v28 = vld [vmem:[#allocation9 + $0xa0] sm:$0xff] }
  0x21   :  { %306 = vmatprep.subr.mxu0 %v114_v12  ;;  %v92_v25 = vld [vmem:[#allocation9 + $0x30] sm:$0xff]  ;;  %v91_v27 = vld [vmem:[#allocation9 + $0x28] sm:$0xff]  ;;  %v90_v29 = vld [vmem:[#allocation9 + $0x20] sm:$0xff] }
  0x22   :  { %307 = vmatpush3.msra.mxu0 %v98_v13  ;;  %v105_v30 = vld [vmem:[#allocation9 + $0x98] sm:$0xff]  ;;  %v195_v31 = vld [vmem:[%s465_s2] sm:$0xff]  ;;  %v103_v35 = vld [vmem:[#allocation9 + $0x88] sm:$0xff] }
  0x23   :  { %308 = vmatprep.subr.mxu0 %v113_v14  ;;  %v89_v32 = vld [vmem:[#allocation9 + $0x18] sm:$0xff]  ;;  %v104_v33 = vld [vmem:[#allocation9 + $0x90] sm:$0xff]  ;;  %v87_v36 = vld [vmem:[#allocation9 + $0x8] sm:$0xff] }
  0x24   :  { %309 = vmatpush3.msra.mxu0 %v97_v15  ;;  %v88_v34 = vld [vmem:[#allocation9 + $0x10] sm:$0xff]  ;;  %v102_v37 = vld [vmem:[#allocation9 + $0x80] sm:$0xff] }
  0x25   :  { %310 = vmatprep.subr.mxu0 %v112_v16  ;;  %v86_v38 = vld [vmem:[#allocation9] sm:$0xff]  ;;  %v64_v47 = vld [vmem:[%s466_s3] sm:$0x3]  ;;  %v225_v16 = vld [vmem:[#allocation4] sm:$0xff] }
  0x26   :  { %311 = vmatpush3.msra.mxu0 %v96_v17  ;;  %v69_v48 = vrot.slane %v64_v47, %v68_v45  ;;  %v73_v49 = vrot.slane %v64_v47, %v72_v46  ;;  %v210_v6 = vld [vmem:[#allocation3] sm:$0xff] }
  0x27   :  { %312 = vmatprep.subr.mxu0 %v111_v18 }
  0x28   :  { %313 = vmatpush3.msra.mxu0 %v95_v19 }
  0x29   :  { %314 = vmatprep.subr.mxu0 %v110_v20  ;;  %v233_v20 = vld [vmem:[#allocation6] sm:$0xff] }
  0x2a   :  { %315 = vmatpush3.msra.mxu0 %v94_v21 }
  0x2b   :  { %316 = vmatprep.subr.mxu0 %v109_v22 }
  0x2c   :  { %317 = vmatpush3.msra.mxu0 %v93_v23 }
  0x2d   :  { %318 = vmatprep.subr.mxu0 %v108_v24 }
  0x2e   :  { %319 = vmatpush3.msra.mxu0 %v92_v25 }
  0x2f   :  { %320 = vmatprep.subr.mxu0 %v107_v26 }
  0x30   :  { %321 = vmatpush3.msra.mxu0 %v91_v27 }
  0x31   :  { %322 = vmatprep.subr.mxu0 %v106_v28 }
  0x32   :  { %323 = vmatpush3.msra.mxu0 %v90_v29 }
  0x33   :  { %324 = vmatprep.subr.mxu0 %v105_v30 }
  0x34   :  { %197 = vperm.xlu0 %342, %v195_v31   ;;  %325 = vmatpush3.msra.mxu0 %v89_v32 }
  0x35   :  { %326 = vmatprep.subr.mxu0 %v104_v33 }
  0x36   :  { %327 = vmatpush3.msra.mxu0 %v88_v34 }
  0x37   :  { %328 = vmatprep.subr.mxu0 %v103_v35 }
  0x38   :  { %329 = vmatpush3.msra.mxu0 %v87_v36 }
  0x39   :  { %330 = vmatprep.subr.mxu0 %v102_v37 }
  0x3a   :  { %331 = vmatpush3.msra.mxu0 %v86_v38 }
  0xa7   :  { %v53_v39 = vpop.xlane.xlu0 %52 }
  0xa8   :  { %v54_v40 = vmax.f32 %v53_v39, 1e-24 }
  0xaa   :  { %344 = vrsqrt.f32 %v54_v40 }
  0xaf   :  { %v198_v44 = vpop.permute.xlu0 %197 }
  0xb0   :  { %vm199_vm0 = vcmp.eq.s32.totalorder %v192_v42, %v198_v44 }
  0xb7   :  { %v345_v50 = vpop.eup %344 }
  0xb8   :  { %v57_v51 = vmul.f32 %v345_v50, %v436_v2  ;;  %v56_v52 = vmul.f32 %v345_v50, %v434_v1 }
  0xba   :  { %182 = vmatprep.mubr.f32.mxu0 %v57_v51  ;;  %v76_v53 = vmul.f32 %v69_v48, %v56_v52  ;;  %v77_v54 = vmul.f32 %v73_v49, %v57_v51 }
  0xbb   :  { %183 = vmatmul.mubr.f32.vlgmr.msra.gmra.mxu0 %v56_v52 }
  0xbc   :  { %v78_v55 = vadd.f32 %v77_v54, %v76_v53 }
  0xbe   :  { %79 = vadd.xlane.f32.xlu0 %v78_v55 }
 0x147   :  { %v80_v57 = vpop.xlane.xlu0 %79 }
 0x148   :  { %v81_v58 = vmul.f32 30.0, %v80_v57 }
 0x14a   :  { %v297_v59 = vadd.f32 -10.5, %v81_v58 }
 0x14c   :  { %83 = vst.msk [vmem:[#allocation5] sm:$0xff] %vm60_vm1, %v297_v59 }
 0x153   :  { %v282_v31 = vld [vmem:[#allocation5] sm:$0xff] }
 0x17b   :  { %v332_v60 = vpop.f32.mrf.mxu0 }
 0x17d   :  { %v333_v61 = vpop.f32.mrf.mxu0 }
 0x17e   :  { %v334_v62 = vadd.f32 %v333_v61, %v332_v60 }
 0x180   :  { %v298_v63 = vclamps-f32 %v334_v62, 1.0 }
 0x182   :  { %v200_v0 = vmul.f32 30.0, %v298_v63 }
 0x184   :  { %v299_v1 = vadd.f32 -10.5, %v200_v0 }
 0x186   :  { %v202_v2 = vsel %vm199_vm0, %v299_v1, %v200_v0  ;;  %v234_v3 = vsel %vm199_vm0, %v299_v1, 0.0 }
 0x187   :  { %v209_v4 = vsel %vm206_vm2, %v202_v2, -1e+30 }
 0x188   :  { %211 = vmax.xlane.f32.xlu1 %v209_v4 }
 0x211   :  { %v212_v7 = vpop.xlane.xlu1 %211 }
 0x212   :  { %v213_v8 = vmax.f32 %v210_v6, %v212_v7 }
 0x214   :  { %v214_v9 = vsub.f32 %v210_v6, %v213_v8  ;;  %232 = vst.msk [vmem:[#allocation3] sm:$0xff] %vm60_vm1, %v213_v8  ;;  %219 = vperm.xlu1 %343, %v213_v8  }
 0x216   :  { %v215_v14 = vmul.f32 1.442695, %v214_v9 }
 0x21b   :  { %v275_v26 = vld [vmem:[#allocation3] sm:$0xff] }
 0x28f   :  { %v220_v10 = vpop.permute.xlu1 %219 }
 0x290   :  { %v222_v11 = vsub.f32 %v209_v4, %v220_v10 }
 0x292   :  { %v223_v12 = vmul.f32 1.442695, %v222_v11 }
 0x294   :  { %346 = vpow2.f32 %v223_v12 }
 0x295   :  { %348 = vpow2.f32 %v215_v14 }
 0x2a1   :  { %v347_v13 = vpop.eup %346 }
 0x2a2   :  { %227 = vadd.xlane.f32.xlu1 %v347_v13  ;;  %v349_v15 = vpop.eup %348 }
 0x2a3   :  { %v226_v17 = vmul.f32 %v349_v15, %v225_v16 }
 0x2a6   :  { %235 = vadd.xlane.f32.xlu1 %v234_v3 }
 0x32b   :  { %v228_v18 = vpop.xlane.xlu1 %227 }
 0x32c   :  { %v229_v19 = vadd.f32 %v228_v18, %v226_v17 }
 0x32e   :  { %231 = vst.msk [vmem:[#allocation4] sm:$0xff] %vm60_vm1, %v229_v19 }
 0x32f   :  { %v236_v21 = vpop.xlane.xlu1 %235 }
 0x330   :  { %v237_v22 = vadd.f32 %v236_v21, %v233_v20 }
 0x332   :  { %238 = vst.msk [vmem:[#allocation6] sm:$0xff] %vm60_vm1, %v237_v22 }
 0x335   :  { %v276_v23 = vld [vmem:[#allocation4] sm:$0xff] }
 0x336   :  { %350 = vlog2.f32 %v276_v23 }
 0x339   :  { %v280_v28 = vld [vmem:[#allocation6] sm:$0xff] }
 0x343   :  { %v351_v24 = vpop.eup %350 }
 0x344   :  { %v278_v25 = vmul.f32 0.6931472, %v351_v24 }
 0x346   :  { %v279_v27 = vadd.f32 %v278_v25, %v275_v26 }
 0x348   :  { %v281_v29 = vsub.f32 %v280_v28, %v279_v27  ;;  %v283_v30 = vmul.f32 16.0, %v279_v27 }
 0x34a   :  { %v284_v32 = vsub.f32 %v282_v31, %v283_v30  ;;  %v285_v33 = vmul.f32 0.9, %v281_v29 }
 0x34c   :  { %v286_v34 = vmul.f32 0.00625, %v284_v32 }
 0x34e   :  { %v287_v35 = vadd.f32 %v286_v34, %v285_v33 }
 0x350   :  { %v288_v36 = vsub.f32 0.0, %v287_v35 }
 0x352   :  { %290 = vst.msk [vmem:[%s467_s4] sm:$0xff] %vm60_vm1, %v288_v36 }
 0x353   :  { %295 = vsyncpa [#allocation8], 1 }
 0x354   :  { %296 = vsyncpa [#allocation10], 1 }

</bundles_post_ra>
